<compile_context>
chip_gen: v7x
topology: tpu7x:2x2x1
jax: 0.10.0
libtpu: 0.0.40
codegen_flags: <defaults>
</compile_context>

<pallas_src>
import jax
import jax.numpy as jnp
from jax.experimental import pallas as pl
from jax.experimental.pallas import tpu as pltpu


def _pointwise_conv_kernel(x_ref, w_ref, b_ref, o_ref):
    # x_ref: (C_in, THW)   activation tile, spatial on the lane axis
    # w_ref: (C_out, C_in) weights (grid-invariant, stays resident in VMEM)
    # b_ref: (C_out, 1)    bias, kept in f32
    # o_ref: (C_out, THW)  output tile (lane-dense stores)
    acc = jnp.dot(w_ref[...], x_ref[...], preferred_element_type=jnp.float32)
    # Epilogue (bias add) in f32 regardless of input dtype; cast only at the store.
    o_ref[...] = (acc + b_ref[...]).astype(o_ref.dtype)


def _choose_spatial_tile(hw, c_in, c_out, in_itemsize):
    """Largest lane-aligned tile of the flattened H*W axis that divides hw exactly
    and keeps double-buffered (input + output) blocks comfortably inside VMEM,
    sized against v7x's smaller 64 MiB VMEM."""
    budget = 16 * 1024 * 1024                      # pipeline-buffer budget (bytes)
    per_col = 2 * (c_in * in_itemsize + c_out * 4)  # double-buffered bytes / spatial column
    max_thw = max(128, budget // max(per_col, 1))
    if hw % 128 != 0:
        # Fall back to the full spatial extent (block == full array dim is always legal).
        return hw
    for cand in (8192, 4096, 2048, 1024, 512, 256, 128):
        if cand <= hw and cand <= max_thw and hw % cand == 0:
            return cand
    return hw


def outconv_pallas(x_nchw, weight, bias, *, compute_dtype=None):
    """1x1 conv forward (PyTorch semantics).

    x_nchw : (N, C_in, H, W)
    weight : (C_out, C_in, 1, 1)   (PyTorch Conv2d weight layout)
    bias   : (C_out,)
    compute_dtype : optionally cast activations/weights (e.g. jnp.bfloat16) for the
                    matmul; accumulation + bias stay in f32, output keeps x's dtype.
    returns: (N, C_out, H, W)
    """
    n, c_in, h, w = x_nchw.shape
    c_out = weight.shape[0]
    hw = h * w
    out_dtype = x_nchw.dtype

    # Free reshapes only -- no NCHW<->NHWC transposes / extra HBM round trips.
    x_mat = x_nchw.reshape(n, c_in, hw)                     # (N, C_in, H*W)
    w_mat = weight.reshape(c_out, c_in)                     # (C_out, C_in)
    b_col = bias.reshape(c_out, 1).astype(jnp.float32)      # (C_out, 1), f32 epilogue

    if compute_dtype is not None:
        x_mat = x_mat.astype(compute_dtype)
        w_mat = w_mat.astype(compute_dtype)

    thw = _choose_spatial_tile(hw, c_in, c_out, jnp.dtype(x_mat.dtype).itemsize)
    grid = (n, hw // thw)

    flops = 2 * n * hw * c_in * c_out
    bytes_accessed = (
        x_mat.size * jnp.dtype(x_mat.dtype).itemsize
        + w_mat.size * jnp.dtype(w_mat.dtype).itemsize
        + b_col.size * 4
        + n * c_out * hw * jnp.dtype(out_dtype).itemsize
    )

    out_mat = pl.pallas_call(
        _pointwise_conv_kernel,
        out_shape=jax.ShapeDtypeStruct((n, c_out, hw), out_dtype),
        grid_spec=pltpu.PrefetchScalarGridSpec(
            num_scalar_prefetch=0,
            grid=grid,
            in_specs=[
                pl.BlockSpec((None, c_in, thw), lambda b, t: (b, 0, t)),
                pl.BlockSpec((c_out, c_in), lambda b, t: (0, 0)),
                pl.BlockSpec((c_out, 1), lambda b, t: (0, 0)),
            ],
            out_specs=pl.BlockSpec((None, c_out, thw), lambda b, t: (b, 0, t)),
        ),
        compiler_params=pltpu.CompilerParams(
            dimension_semantics=("parallel", "parallel"),
            vmem_limit_bytes=48 * 1024 * 1024,
        ),
        cost_estimate=pl.CostEstimate(
            flops=flops, transcendentals=0, bytes_accessed=bytes_accessed
        ),
    )(x_mat, w_mat, b_col)

    return out_mat.reshape(n, c_out, h, w)


if __name__ == "__main__":
    key = jax.random.PRNGKey(0)
    k_x, k_w, k_b, k_x2, k_w2, k_b2 = jax.random.split(key, 6)

    # --- Small case consistent with the UNet I/O (4 channels in, 3 out) -----------
    N, C_IN, C_OUT, H, W = 2, 4, 3, 16, 16
    x = jax.random.normal(k_x, (N, C_IN, H, W), dtype=jnp.float32)
    bound = 1.0 / (C_IN ** 0.5)
    weight = jax.random.uniform(
        k_w, (C_OUT, C_IN, 1, 1), minval=-bound, maxval=bound, dtype=jnp.float32
    )
    bias = jax.random.uniform(
        k_b, (C_OUT,), minval=-bound, maxval=bound, dtype=jnp.float32
    )

    out = jax.block_until_ready(outconv_pallas(x, weight, bias))
    ref = (
        jnp.einsum(
            "nchw,oc->nohw",
            x,
            weight.reshape(C_OUT, C_IN),
            precision=jax.lax.Precision.HIGHEST,
        )
        + bias[None, :, None, None]
    )
    assert out.shape == (N, C_OUT, H, W)
    assert jnp.allclose(out, ref, atol=1e-5, rtol=1e-5)

    # bf16 activation/weight path (f32 accumulate + f32 epilogue, f32 output).
    out_bf16 = jax.block_until_ready(
        outconv_pallas(x, weight, bias, compute_dtype=jnp.bfloat16)
    )
    assert jnp.allclose(out_bf16, ref, atol=5e-2, rtol=5e-2)

    # --- UNet-realistic outconv head (64 -> 3) exercising the tiled grid -----------
    N2, C2_IN, H2, W2 = 2, 64, 128, 128
    x2 = jax.random.normal(k_x2, (N2, C2_IN, H2, W2), dtype=jnp.float32)
    bound2 = 1.0 / (C2_IN ** 0.5)
    weight2 = jax.random.uniform(
        k_w2, (C_OUT, C2_IN, 1, 1), minval=-bound2, maxval=bound2, dtype=jnp.float32
    )
    bias2 = jax.random.uniform(
        k_b2, (C_OUT,), minval=-bound2, maxval=bound2, dtype=jnp.float32
    )
    out2 = jax.block_until_ready(outconv_pallas(x2, weight2, bias2))
    ref2 = (
        jnp.einsum(
            "nchw,oc->nohw",
            x2,
            weight2.reshape(C_OUT, C2_IN),
            precision=jax.lax.Precision.HIGHEST,
        )
        + bias2[None, :, None, None]
    )
    assert out2.shape == (N2, C_OUT, H2, W2)
    assert jnp.allclose(out2, ref2, atol=1e-3, rtol=1e-3)

    print("KERNEL_OK")
</pallas_src>

<mosaic_0001>
module attributes {stable_mosaic.version = 11 : i64} {
  func.func @_pointwise_conv_kernel(%arg0: i32, %arg1: i32, %arg2: memref<1x4x256xf32, #tpu.memory_space<vmem>>, %arg3: memref<3x4xf32, #tpu.memory_space<vmem>>, %arg4: memref<3x1xf32, #tpu.memory_space<vmem>>, %arg5: memref<1x3x256xf32, #tpu.memory_space<vmem>>) attributes {dimension_semantics = [#tpu.dimension_semantics<parallel>, #tpu.dimension_semantics<parallel>], iteration_bounds = array<i64: 2, 1>, scalar_prefetch = 0 : i64, scratch_operands = 0 : i64, tpu.core_type = #tpu.core_type<tc>, window_params = [{transform_indices = @transform_0, window_bounds = array<i64: 1, 4, 256>}, {pipeline_mode = #tpu.pipeline_mode<synchronous>, transform_indices = @transform_1, window_bounds = array<i64: 3, 4>}, {pipeline_mode = #tpu.pipeline_mode<synchronous>, transform_indices = @transform_2, window_bounds = array<i64: 3, 1>}, {transform_indices = @transform_3, window_bounds = array<i64: 1, 3, 256>}]} {
    %c0 = arith.constant 0 : index
    %c0_0 = arith.constant 0 : index
    %0 = vector.load %arg3[%c0, %c0_0] : memref<3x4xf32, #tpu.memory_space<vmem>>, vector<3x4xf32>
    %c0_1 = arith.constant 0 : index
    %c0_2 = arith.constant 0 : index
    %c0_3 = arith.constant 0 : index
    %1 = vector.load %arg2[%c0_1, %c0_2, %c0_3] : memref<1x4x256xf32, #tpu.memory_space<vmem>>, vector<1x4x256xf32>
    %2 = vector.shape_cast %1 : vector<1x4x256xf32> to vector<4x256xf32>
    %cst = arith.constant dense<0.000000e+00> : vector<3x256xf32>
    %3 = tpu.matmul %0, %2, %cst {dimension_numbers = #tpu.dot_dimension_numbers<[1], [0], [0], [1], [0, 0, 1, 1], [], []>} : vector<3x4xf32>, vector<4x256xf32>, vector<3x256xf32> -> vector<3x256xf32>
    %c0_4 = arith.constant 0 : index
    %c0_5 = arith.constant 0 : index
    %4 = vector.load %arg4[%c0_4, %c0_5] : memref<3x1xf32, #tpu.memory_space<vmem>>, vector<3x1xf32>
    %5 = vector.broadcast %4 : vector<3x1xf32> to vector<3x256xf32>
    %6 = arith.addf %3, %5 : vector<3x256xf32>
    %c0_6 = arith.constant 0 : index
    %c0_7 = arith.constant 0 : index
    %c0_8 = arith.constant 0 : index
    %7 = vector.load %arg5[%c0_6, %c0_7, %c0_8] : memref<1x3x256xf32, #tpu.memory_space<vmem>>, vector<1x3x256xf32>
    %8 = vector.shape_cast %7 : vector<1x3x256xf32> to vector<3x256xf32>
    %9 = vector.shape_cast %6 : vector<3x256xf32> to vector<1x3x256xf32>
    tpu.vector_store %arg5[%c0_6, %c0_7, %c0_8], %9 {strides = array<i32>} : memref<1x3x256xf32, #tpu.memory_space<vmem>>, vector<1x3x256xf32>,
    return
  }
  func.func @transform_0(%arg0: i32, %arg1: i32) -> (i32, i32, i32) {
    %c0_i32 = arith.constant 0 : i32
    %c0_i32_0 = arith.constant 0 : i32
    return %arg0, %c0_i32, %arg1 : i32, i32, i32
  }
  func.func @transform_1(%arg0: i32, %arg1: i32) -> (i32, i32) {
    %c0_i32 = arith.constant 0 : i32
    %c0_i32_0 = arith.constant 0 : i32
    %c0_i32_1 = arith.constant 0 : i32
    return %c0_i32, %c0_i32_0 : i32, i32
  }
  func.func @transform_2(%arg0: i32, %arg1: i32) -> (i32, i32) {
    %c0_i32 = arith.constant 0 : i32
    %c0_i32_0 = arith.constant 0 : i32
    %c0_i32_1 = arith.constant 0 : i32
    return %c0_i32, %c0_i32_0 : i32, i32
  }
  func.func @transform_3(%arg0: i32, %arg1: i32) -> (i32, i32, i32) {
    %c0_i32 = arith.constant 0 : i32
    %c0_i32_0 = arith.constant 0 : i32
    return %arg0, %c0_i32, %arg1 : i32, i32, i32
  }
}

</mosaic_0001>

<bundles_post_ra>
// kernel: tpu_custom_call.1
= control target key start
LH: loop header
LB: loop body
LE: loop exit
PB: predicated region body
PF: predicated region fallthrough
CT: control target
= control target key end

     0   :  { %8 = vsyncpa [#allocation3], 0  ;;  %s720_s0 = inlined_call_operand.hbm [shape: f32[2,4,256], index: 0, kind: input, shape index: {}]   ;;  %s721_s1 = inlined_call_operand.vmem [shape: f32[3,4], index: 1, kind: input, shape index: {}]   ;;  %s722_s2 = inlined_call_operand.vmem [shape: f32[3,1], index: 2, kind: input, shape index: {}]   ;;  %s723_s3 = inlined_call_operand.vmem [shape: f32[2,3,256], index: 3, kind: output, shape index: {}]  }
   0x1   :  { %10 = vsyncpa [#allocation3 + $0x1], 0  ;;  %s589_s12 = smov 0   ;;  %s591_s13 = smov 0  }
   0x2   :  { %s593_s14 = smov 0   ;;  %s595_s15 = smov 0  }
   0x3   :  { %s597_s16 = smov 0   ;;  %s599_s17 = smov 0  }
   0x4 LB: > { %s407_s18 = sadd.s32 4294967295, %s564_s17   ;;  %s28_s19 = sadd.s32 1, %s560_s16  ;;  %s564_s17 = sphi %s599_s17, %s16_s17   ;;  %s560_s16 = sphi %s597_s16, %s733_s16   ;;  %s556_s15 = sphi %s595_s15, %s732_s15   ;;  %s552_s14 = sphi %s593_s14, %s731_s14   ;;  %s548_s13 = sphi %s591_s13, %s730_s13   ;;  %s544_s12 = sphi %s589_s12, %s729_s12  }
   0x5   : > { %p30_p0 = scmp.ge.s32.totalorder %s28_s19, 2  ;;  %s37_s20 = sadd.s32 1, %s552_s14 }
   0x6   : > { %p44_p1 = scmp.ne.s32.totalorder %s552_s14, %s548_s13  ;;  %p45_p2 = scmp.eq.s32.totalorder %s564_s17, 0 }
   0x7   : > { %s735_s19 = smov (%p30_p0, %s28_s19), 0  ;;  %p50_p4 = scmp.ne.s32.totalorder %s548_s13, %s544_s12 }
   0x8   : > { %p625_p3 = por %p45_p2, %p44_p1  ;;  %s32_s22 = ssub.s32 %s560_s16, %s735_s19 }
   0x9   : > { %p51_p5 = scmp.eq.s32.totalorder %s407_s18, 0  ;;  %p35_p6 = scmp.eq.s32.totalorder %s32_s22, 0 }
   0xa   : > { %p431_p8 = scmp.lt.s32.totalorder %s564_s17, 2  ;;  %s150_s25 = sand.u32 1, %s552_s14  }
   0xb   : > { %p632_p7 = por %p51_p5, %p50_p4  ;;  %s423_s26 = sshll.u32 %s560_s16, 7 }
   0xc   : > { %s638_s24 = scalar_select %p35_p6, %s552_s14, %s37_s20  }
   0xd   : > { %s411_s27 = sshll.u32 %s150_s25, 3  ;;  %s645_s30 = scalar_lea.hbm %s720_s0, %s423_s26 }
   0xe   : > { %s154_s4 = scalar_lea.vmem [#allocation2], %s411_s27  ;;  %p649_p9 = pnand %p431_p8, %p625_p3 }
   0xf   : > { %s164_s5 = sshll.u32 %s154_s4, 4  ;;  %s151_s7 = scalar_lea.sflag [#allocation3], %s150_s25  ;;  %s653_s5 = int_to_ptr.vmem [resolvable:$true] %s164_s5 }
  0x10   : > { %s484_s8 = scalar_lea.hbm %s645_s30, 128  ;;  %p486_p13 = pneg %p649_p9 }
  0x11   : > { %p485_p12 = scmp.ne.s32.totalorder %s645_s30, %s484_s8  ;;  %s489_s11 = scalar_lea.hbm %s720_s0, 256 }
  0x12   : > { %p490_p2 = scmp.lt.u32.totalorder %s645_s30, %s720_s0  ;;  %p491_p3 = scmp.lt.u32.totalorder %s489_s11, %s484_s8 }
  0x13   : > { %p487_p0 = pnand %p486_p13, %p485_p12  ;;  %p493_p5 = scmp.lt.u32.totalorder %s484_s8, %s645_s30 }
  0x14   : > { %p492_p4 = por %p491_p3, %p490_p2 }
  0x15   : > { %p488_p1 = pneg %p487_p0 }
  0x16   : > { %p494_p6 = por %p493_p5, %p492_p4 }
  0x18   : > { %p495_p8 = pnand %p494_p6, %p488_p1 }
  0x1a   : > { %498 = shalt.err (!%p495_p8)
}
  0x1b   : > { %s499_s20 = scalar_lea.vmem %s653_s5, 128  ;;  %s566_s21 = smov [#allocation2]  }
  0x1c   : > { %p500_p12 = scmp.ne.s32.totalorder %s653_s5, %s499_s20  ;;  %s504_s22 = sshll.u32 %s566_s21, 4  ;;  %s505_s22 = int_to_ptr.vmem [resolvable:$false] %s504_s22 }
  0x1d   : > { %s506_s25 = scalar_lea.vmem %s505_s22, 256  ;;  %p507_p11 = scmp.lt.s32.totalorder %s653_s5, %s505_s22 }
  0x1e   : > { %p502_p0 = pnand %p500_p12, %p486_p13  ;;  %p508_p2 = scmp.lt.s32.totalorder %s506_s25, %s499_s20 }
  0x20   : > { %p503_p10 = pneg %p502_p0  ;;  %p509_p3 = por %p508_p2, %p507_p11 }
  0x22   : > { %p510_p4 = pnand %p509_p3, %p503_p10 }
  0x24   : > { %513 = shalt.err (!%p510_p4)
}
  0x25   : > { %430 = dma.hbm_to_vmem [thread:$0]  (!%p649_p9), %s645_s30, 128, %s653_s5, %s151_s7  }
  0x26   : > { %p727_p1 = scmp.lt.s32.totalorder %s564_s17, 3  ;;  %p728_p5 = scmp.ge.s32.totalorder %s564_s17, 1 }
  0x28   : > { %p170_p13 = pnand %p728_p5, %p727_p1 }
  0x29   : > { %s175_s26 = sand.u32 (!%p170_p13), 1, %s548_s13  }
  0x2a   : > { %173 = sbr.rel (%p170_p13) target bundleno = 273 (0x111), region = 32  ;;  %s415_s27 = sshll.u32 (!%p170_p13), %s175_s26, 3 }
  0x2b   : > { %s176_s28 = scalar_lea.sflag (!%p170_p13), [#allocation3], %s175_s26  ;;  %s179_s29 = scalar_lea.vmem (!%p170_p13), [#allocation2], %s415_s27 }
  0x31   : > { %539 = dma.done.wait (%p632_p7), %s176_s28, 128  }
  0x32   : > { %541 = vsyncadd (%p632_p7), %s176_s28, 4294967168  ;;  %v567_v0 = vmov 0.0   ;;  %v568_v1 = vmov 0   ;;  %v218_v2 = vld [vmem:[%s179_s29] sm:$0xff]  ;;  %vm231_vm0 = vcmask 1043456   ;;  %vm227_vm1 = vcmask 31744  }
  0x33   : > { %300 = vmatprep.mubr.f32.mxu0 %v567_v0  ;;  %482 = vset.pattern.permute.xlu0 %v568_v1  ;;  %v219_v3 = vld [vmem:[%s722_s2] sm:$0x7]  ;;  %v226_v4 = vcombine.high %v218_v2, %v218_v2  ;;  %p208_p7 = scmp.lt.s32.totalorder %s556_s15, 1 }
  0x34   : > { %222 = vperm.xlu0 %482, %v219_v3   ;;  %v217_v5 = vld [vmem:[%s721_s1] sm:$0x7] }
  0x35   : > { %418 = vmatprep.subr.msk.mxu0 %vm231_vm0, %v226_v4  ;;  %s737_s15 = smov (!%p208_p7, %s556_s15), 1 }
  0x36   : > { %419 = vmatpush1.msk.msra.mxu0 %vm231_vm0, %v218_v2  ;;  %s424_s23 = sshll.u32 %s737_s15, 3 }
  0x37   : > { %420 = vmatmul.mubr.msk.f32.vlgmr.msra.gmra.mrb[0].mxu0 %vm227_vm1, %v217_v5  ;;  %s215_s9 = scalar_lea.vmem %s723_s3, %s424_s23 }
  0xb3   : > { %v223_v6 = vpop.permute.xlu0 %222 }
 0x10a   : > { %v302_v7 = vpop.f32.mrb[0].mxu0 }
 0x10b   : > { %v303_v8 = vadd.f32 %v302_v7, %v223_v6  ;;  %v304_v9 = vpop.f32.mrb[1].mxu0 }
 0x10c   : > { %v305_v10 = vadd.f32 %v304_v9, %v223_v6 }
 0x10e   : > { %v309_v11 = vcombine.low %v303_v8, %v305_v10 }
 0x110   : > { %311 = vst [vmem:[%s215_s9] sm:$0x77] %v309_v11 }
 0x111 PF: > { %s16_s17 = sadd.s32 1, %s564_s17   ;;  %s729_s12 = smov %s548_s13 }
 0x112   : > { %p13_p9 = scmp.ge.s32.totalorder %s16_s17, 4   ;;  %s730_s13 = smov %s552_s14 }
 0x113   : > { %s731_s14 = smov %s638_s24  ;;  %s732_s15 = smov %s560_s16 }
 0x114   : > { %s733_s16 = smov %s735_s19  ;;  %15 = sbr.rel (!%p13_p9) target bundleno = 4 (0x4), region = 72 }
 0x11b   :  { %342 = vsyncpa [#allocation3], 1 }
 0x11c   :  { %344 = vsyncpa [#allocation3 + $0x1], 1 }

</bundles_post_ra>
